<compile_context>
chip_gen: v5e
topology: v5e:2x2
jax: 0.10.0
libtpu: 0.0.40
codegen_flags: <defaults>
</compile_context>

<pallas_src>
import functools

import jax
import jax.numpy as jnp
from jax.experimental import pallas as pl
from jax.experimental.pallas import tpu as pltpu

_MIB = 1024 * 1024
_LANES = 128


def _round_up(x, m):
    return ((x + m - 1) // m) * m


def _tpu_vmem_capacity():
    """Physical VMEM bytes; conservative (v7x = smallest) if query fails."""
    try:
        return int(pltpu.get_tpu_info().vmem_capacity_bytes)
    except Exception:
        return 64 * _MIB


def _pick_rs_tiles(R, S, sub, itemsize, budget, two_row_tiles=True):
    """Pick (rows_tile, s_tile) for a (R, S) row matrix under `budget` bytes.

    s_tile is lane-dense (multiple of 128, or the full S extent); rows_tile is
    a multiple of the dtype sublane tile.  Optionally capped so there are at
    least two row tiles (megacore sharding on the 'parallel' rows axis).
    """
    r_full = _round_up(R, sub)
    s_pad = _round_up(S, _LANES)
    if sub * s_pad * itemsize <= budget:
        s_tile = S                                   # full extent in one block
    else:
        s_tile = (budget // (sub * itemsize)) // _LANES * _LANES
        s_tile = max(_LANES, min(s_tile, (S // _LANES) * _LANES))
    s_bytes = _round_up(s_tile, _LANES) * itemsize
    rows_tile = max(sub, (budget // s_bytes) // sub * sub)
    rows_tile = min(rows_tile, r_full)
    if two_row_tiles and r_full >= 2 * sub:
        rows_tile = min(rows_tile, _round_up((R + 1) // 2, sub))
    return rows_tile, s_tile


# --------------------------- fused single pass ------------------------------


def _fused_kernel(x_ref, w_ref, b_ref, o_ref, *, inv_s):
    # x_ref: (NB, C, S) resident slab; w_ref: (C, C) [in, out]; b_ref: (1, C)
    x = x_ref[...].astype(jnp.float32)
    avg = jnp.sum(x, axis=-1) * inv_s                               # (NB, C)
    logits = jnp.dot(avg, w_ref[...],
                     preferred_element_type=jnp.float32) + b_ref[...]
    gate = jax.nn.sigmoid(logits)                                   # (NB, C)
    o_ref[...] = (x * gate[:, :, None]).astype(o_ref.dtype)


# --------------------------- streaming fallback ------------------------------


def _sum_kernel(x_ref, sum_ref, *, s_total, s_tile, need_mask):
    # x_ref: (RT, S_TILE) tile of rows; sum_ref: (RT, 1) f32 resident sums.
    s_idx = pl.program_id(1)

    @pl.when(s_idx == 0)
    def _():
        sum_ref[...] = jnp.zeros_like(sum_ref)

    if need_mask:
        last = pl.num_programs(1) - 1

        @pl.when(s_idx != last)
        def _():
            sum_ref[...] += jnp.sum(x_ref[...].astype(jnp.float32),
                                    axis=-1, keepdims=True)

        @pl.when(s_idx == last)  # only the ragged remainder tile pays the mask
        def _():
            x = x_ref[...].astype(jnp.float32)
            lane = jax.lax.broadcasted_iota(jnp.int32, x.shape, x.ndim - 1)
            x = jnp.where(s_idx * s_tile + lane < s_total, x, 0.0)
            sum_ref[...] += jnp.sum(x, axis=-1, keepdims=True)
    else:
        sum_ref[...] += jnp.sum(x_ref[...].astype(jnp.float32),
                                axis=-1, keepdims=True)


def _scale_kernel(gate_ref, x_ref, o_ref):
    # gate_ref: (RT, 1) f32; x_ref / o_ref: (RT, S_TILE)
    o_ref[...] = (x_ref[...].astype(jnp.float32) * gate_ref[...]).astype(
        o_ref.dtype)


# ------------------------------- wrapper -------------------------------------


def self_gating(x, w, b, *, force_two_pass=False):
    """x: (N, C, T, H, W); w: (C, C) PyTorch Linear layout (out, in); b: (C,)."""
    N, C, T, H, W = x.shape
    S = T * H * W
    dtype = x.dtype
    itemsize = jnp.dtype(dtype).itemsize
    sub = 32 // itemsize            # sublane tile: 8 f32 / 16 bf16 / 32 int8

    vmem_cap = _tpu_vmem_capacity()
    big_vmem = vmem_cap >= 96 * _MIB              # v5e / v6e (128 MiB physical)
    vmem_limit = 48 * _MIB if big_vmem else 40 * _MIB

    w_t = jnp.asarray(w, jnp.float32).T           # (in, out): avg @ w.T layout
    b2 = jnp.asarray(b, jnp.float32).reshape(1, C)

    # Padded per-batch slab size as it will actually sit in VMEM.
    c_pad = _round_up(C, sub)
    s_pad = _round_up(S, _LANES)
    slab1 = c_pad * s_pad * itemsize

    # ---------------- fused single-pass fast path ----------------------------
    if not force_two_pass:
        fused_x_budget = 6 * _MIB if big_vmem else 4 * _MIB
        nb = max(1, min(N, fused_x_budget // max(slab1, 1)))
        if N >= 2:
            nb = min(nb, max(1, N // 2))          # >= 2 batch tiles (megacore)
        slab = nb * slab1
        w_bytes = C * C * 4 + C * 4
        # 2x double-buffered input + 2x output + one f32 temp + weights + slack
        fused_footprint = 4 * slab + nb * c_pad * s_pad * 4 + w_bytes + 2 * _MIB
        if fused_footprint <= vmem_limit - 2 * _MIB:
            x_flat = x.reshape(N, C, S)
            n_btiles = pl.cdiv(N, nb)
            out = pl.pallas_call(
                functools.partial(_fused_kernel, inv_s=1.0 / S),
                out_shape=jax.ShapeDtypeStruct((N, C, S), dtype),
                grid_spec=pltpu.PrefetchScalarGridSpec(
                    num_scalar_prefetch=0,
                    grid=(n_btiles,),
                    in_specs=[
                        pl.BlockSpec((nb, C, S), lambda n: (n, 0, 0)),   # x
                        pl.BlockSpec((C, C), lambda n: (0, 0)),          # w.T
                        pl.BlockSpec((1, C), lambda n: (0, 0)),          # bias
                    ],
                    out_specs=pl.BlockSpec((nb, C, S), lambda n: (n, 0, 0)),
                ),
                compiler_params=pltpu.CompilerParams(
                    dimension_semantics=("parallel",),
                    vmem_limit_bytes=vmem_limit),
            )(x_flat, w_t, b2)
            return out.reshape(N, C, T, H, W)

    # ---------------- fallback: two streaming passes over (N*C, S) rows ------
    R = N * C
    x_rows = x.reshape(R, S)

    stream_budget = 4 * _MIB                      # pass-2 x tile budget
    rt1, st1 = _pick_rs_tiles(R, S, sub, itemsize, 2 * stream_budget)
    rt2, st2 = _pick_rs_tiles(R, S, sub, itemsize, stream_budget)
    need_mask = (S % st1) != 0

    # Pass 1: per-row sums over the spatiotemporal axis (f32 accumulator).
    sums = pl.pallas_call(
        functools.partial(_sum_kernel, s_total=S, s_tile=st1,
                          need_mask=need_mask),
        out_shape=jax.ShapeDtypeStruct((R, 1), jnp.float32),
        grid_spec=pltpu.PrefetchScalarGridSpec(
            num_scalar_prefetch=0,
            grid=(pl.cdiv(R, rt1), pl.cdiv(S, st1)),
            in_specs=[pl.BlockSpec((rt1, st1), lambda r, s: (r, s))],
            out_specs=pl.BlockSpec((rt1, 1), lambda r, s: (r, 0)),
        ),
        compiler_params=pltpu.CompilerParams(
            dimension_semantics=("parallel", "arbitrary"),
            vmem_limit_bytes=vmem_limit),
    )(x_rows)

    # Gate: tiny (N,C)@(C,C) GEMM + bias + sigmoid in plain JAX / f32.
    avg = sums.reshape(N, C) * (1.0 / S)
    gate = jax.nn.sigmoid(avg @ w_t + b2)                          # (N, C) f32
    gate_rows = gate.reshape(R, 1)

    # Pass 2: streaming lane-dense broadcast scale.
    out_rows = pl.pallas_call(
        _scale_kernel,
        out_shape=jax.ShapeDtypeStruct((R, S), dtype),
        grid_spec=pltpu.PrefetchScalarGridSpec(
            num_scalar_prefetch=0,
            grid=(pl.cdiv(R, rt2), pl.cdiv(S, st2)),
            in_specs=[
                pl.BlockSpec((rt2, 1), lambda r, s: (r, 0)),       # gate
                pl.BlockSpec((rt2, st2), lambda r, s: (r, s)),     # x
            ],
            out_specs=pl.BlockSpec((rt2, st2), lambda r, s: (r, s)),
        ),
        compiler_params=pltpu.CompilerParams(
            dimension_semantics=("parallel", "parallel"),
            vmem_limit_bytes=vmem_limit),
    )(gate_rows, x_rows)

    return out_rows.reshape(N, C, T, H, W)


if __name__ == "__main__":
    key = jax.random.PRNGKey(0)
    kx, kw, kb, kx2 = jax.random.split(key, 4)

    N, C, T, H, W = 2, 8, 4, 8, 8                 # S = 256 (fused fast path)
    x = jax.random.normal(kx, (N, C, T, H, W), dtype=jnp.float32)
    bound = 1.0 / (C ** 0.5)                      # nn.Linear-style init bound
    w = jax.random.uniform(kw, (C, C), minval=-bound, maxval=bound,
                           dtype=jnp.float32)     # (out, in) PyTorch layout
    b = jax.random.uniform(kb, (C,), minval=-bound, maxval=bound,
                           dtype=jnp.float32)

    def ref_fn(xx):
        avg_ref = jnp.mean(xx, axis=(2, 3, 4))
        gate_ref = jax.nn.sigmoid(avg_ref @ w.T + b)
        return gate_ref[:, :, None, None, None] * xx

    # Fused single-pass path.
    out = jax.block_until_ready(self_gating(x, w, b))
    assert jnp.allclose(out, ref_fn(x), atol=1e-5, rtol=1e-5), \
        "fused path mismatch vs reference"

    # Two-pass streaming path (non-128-multiple spatiotemporal extent).
    x2 = jax.random.normal(kx2, (2, 8, 3, 5, 7), dtype=jnp.float32)  # S = 105
    out2 = jax.block_until_ready(self_gating(x2, w, b, force_two_pass=True))
    assert jnp.allclose(out2, ref_fn(x2), atol=1e-5, rtol=1e-5), \
        "two-pass path mismatch vs reference"

    print("KERNEL_OK")
</pallas_src>

<mosaic_0001>
module attributes {stable_mosaic.version = 11 : i64} {
  func.func @_fused_kernel(%arg0: i32, %arg1: memref<1x8x256xf32, #tpu.memory_space<vmem>>, %arg2: memref<8x8xf32, #tpu.memory_space<vmem>>, %arg3: memref<1x8xf32, #tpu.memory_space<vmem>>, %arg4: memref<1x8x256xf32, #tpu.memory_space<vmem>>) attributes {dimension_semantics = [#tpu.dimension_semantics<parallel>], iteration_bounds = array<i64: 2>, scalar_prefetch = 0 : i64, scratch_operands = 0 : i64, tpu.core_type = #tpu.core_type<tc>, window_params = [{transform_indices = @transform_0, window_bounds = array<i64: 1, 8, 256>}, {pipeline_mode = #tpu.pipeline_mode<synchronous>, transform_indices = @transform_1, window_bounds = array<i64: 8, 8>}, {pipeline_mode = #tpu.pipeline_mode<synchronous>, transform_indices = @transform_2, window_bounds = array<i64: 1, 8>}, {transform_indices = @transform_3, window_bounds = array<i64: 1, 8, 256>}]} {
    %c0 = arith.constant 0 : index
    %c0_0 = arith.constant 0 : index
    %c0_1 = arith.constant 0 : index
    %0 = vector.load %arg1[%c0, %c0_0, %c0_1] : memref<1x8x256xf32, #tpu.memory_space<vmem>>, vector<1x8x256xf32>
    %cst = arith.constant dense<0.000000e+00> : vector<1x8xf32>
    %1 = vector.multi_reduction <add>, %0, %cst [2] : vector<1x8x256xf32> to vector<1x8xf32>
    %cst_2 = arith.constant 3.906250e-03 : f32
    %2 = vector.broadcast %cst_2 : f32 to vector<1x8xf32>
    %3 = arith.mulf %1, %2 : vector<1x8xf32>
    %c0_3 = arith.constant 0 : index
    %c0_4 = arith.constant 0 : index
    %4 = vector.load %arg2[%c0_3, %c0_4] : memref<8x8xf32, #tpu.memory_space<vmem>>, vector<8x8xf32>
    %cst_5 = arith.constant dense<0.000000e+00> : vector<1x8xf32>
    %5 = tpu.matmul %3, %4, %cst_5 {dimension_numbers = #tpu.dot_dimension_numbers<[1], [0], [0], [1], [0, 0, 1, 1], [], []>} : vector<1x8xf32>, vector<8x8xf32>, vector<1x8xf32> -> vector<1x8xf32>
    %c0_6 = arith.constant 0 : index
    %c0_7 = arith.constant 0 : index
    %6 = vector.load %arg3[%c0_6, %c0_7] : memref<1x8xf32, #tpu.memory_space<vmem>>, vector<1x8xf32>
    %7 = arith.addf %5, %6 : vector<1x8xf32>
    %8 = arith.negf %7 : vector<1x8xf32>
    %9 = math.exp %8 : vector<1x8xf32>
    %cst_8 = arith.constant 1.000000e+00 : f32
    %10 = vector.broadcast %cst_8 : f32 to vector<1x8xf32>
    %11 = arith.addf %10, %9 : vector<1x8xf32>
    %12 = arith.divf %10, %11 : vector<1x8xf32>
    %13 = vector.shape_cast %12 : vector<1x8xf32> to vector<1x8x1xf32>
    %14 = vector.broadcast %13 : vector<1x8x1xf32> to vector<1x8x256xf32>
    %15 = arith.mulf %0, %14 : vector<1x8x256xf32>
    %c0_9 = arith.constant 0 : index
    %c0_10 = arith.constant 0 : index
    %c0_11 = arith.constant 0 : index
    %16 = vector.load %arg4[%c0_9, %c0_10, %c0_11] : memref<1x8x256xf32, #tpu.memory_space<vmem>>, vector<1x8x256xf32>
    tpu.vector_store %arg4[%c0_9, %c0_10, %c0_11], %15 {strides = array<i32>} : memref<1x8x256xf32, #tpu.memory_space<vmem>>, vector<1x8x256xf32>,
    return
  }
  func.func @transform_0(%arg0: i32) -> (i32, i32, i32) {
    %c0_i32 = arith.constant 0 : i32
    %c0_i32_0 = arith.constant 0 : i32
    %c0_i32_1 = arith.constant 0 : i32
    return %arg0, %c0_i32, %c0_i32_0 : i32, i32, i32
  }
  func.func @transform_1(%arg0: i32) -> (i32, i32) {
    %c0_i32 = arith.constant 0 : i32
    %c0_i32_0 = arith.constant 0 : i32
    %c0_i32_1 = arith.constant 0 : i32
    return %c0_i32, %c0_i32_0 : i32, i32
  }
  func.func @transform_2(%arg0: i32) -> (i32, i32) {
    %c0_i32 = arith.constant 0 : i32
    %c0_i32_0 = arith.constant 0 : i32
    %c0_i32_1 = arith.constant 0 : i32
    return %c0_i32, %c0_i32_0 : i32, i32
  }
  func.func @transform_3(%arg0: i32) -> (i32, i32, i32) {
    %c0_i32 = arith.constant 0 : i32
    %c0_i32_0 = arith.constant 0 : i32
    %c0_i32_1 = arith.constant 0 : i32
    return %arg0, %c0_i32, %c0_i32_0 : i32, i32, i32
  }
}

</mosaic_0001>

<bundles_post_ra>
// kernel: tpu_custom_call.1
= control target key start
LH: loop header
LB: loop body
LE: loop exit
PB: predicated region body
PF: predicated region fallthrough
CT: control target
= control target key end

     0   :  { %8 = vsyncpa [#allocation3], 0  ;;  %s746_s0 = inlined_call_operand.hbm [shape: f32[2,8,256], index: 0, kind: input, shape index: {}]   ;;  %s747_s1 = inlined_call_operand.hbm [shape: f32[8,8], index: 1, kind: input, shape index: {}]   ;;  %s748_s2 = inlined_call_operand.vmem [shape: f32[1,8], index: 2, kind: input, shape index: {}]   ;;  %s749_s3 = inlined_call_operand.hbm [shape: f32[2,8,256], index: 3, kind: output, shape index: {}]  }
   0x1   :  { %10 = vsyncpa [#allocation3 + $0x1], 0 }
   0x2   :  { %11 = vsyncpa [#allocation6], 0 }
   0x3   :  { %12 = vsyncpa [#allocation4], 0 }
   0x4   :  { %14 = vsyncpa [#allocation4 + $0x1], 0  ;;  %s601_s12 = smov 0   ;;  %s603_s13 = smov 0  }
   0x5   :  { %s605_s14 = smov 0   ;;  %s607_s15 = smov 0  }
   0x6 LB: > { %s622_s16 = sadd.s32 4294967295, %s578_s15   ;;  %s366_s17 = sadd.s32 4294967294, %s578_s15   ;;  %s578_s15 = sphi %s607_s15, %s759_s15   ;;  %s574_s14 = sphi %s605_s14, %s758_s14   ;;  %s570_s13 = sphi %s603_s13, %s757_s13   ;;  %s566_s12 = sphi %s601_s12, %s756_s12  }
   0x7   : > { %p40_p0 = scmp.ne.s32.totalorder %s570_s13, %s566_s12  ;;  %p41_p1 = scmp.eq.s32.totalorder %s622_s16, 0 }
   0x8   : > { %p106_p2 = scmp.eq.s32.totalorder %s622_s16, 1  ;;  %p112_p3 = scmp.eq.s32.totalorder %s366_s17, 1 }
   0x9   : > { %p631_p4 = por %p41_p1, %p40_p0  ;;  %p367_p5 = scmp.ge.s32.totalorder %s578_s15, 1 }
   0xa   : > { %p636_p6 = por %p112_p3, %p40_p0  ;;  %p119_p7 = scmp.lt.s32.totalorder %s578_s15, 3 }
   0xb   : > { %s131_s22 = sshll.u32 %s747_s1, 4  ;;  %s580_s24 = smov [#allocation5]   ;;  %s132_s22 = int_to_ptr.hbm [resolvable:$true] %s131_s22 }
   0xc   : > { %p644_p8 = pnand %p367_p5, %p119_p7  ;;  %s133_s25 = sshll.u32 %s580_s24, 4  ;;  %s134_s25 = int_to_ptr.vmem [resolvable:$true] %s133_s25 }
   0xd   : > { %s654_s26 = sadd.s32 1, %s578_s15   ;;  %s27_s27 = sadd.s32 1, %s574_s14 }
   0xe   : > { %p394_p10 = pneg %p644_p8  ;;  %s24_s28 = ssub.s32 %s578_s15, %s654_s26 }
   0xf   : > { %p25_p12 = scmp.eq.s32.totalorder %s24_s28, 0  ;;  %p34_p13 = scmp.ne.s32.totalorder %s574_s14, %s570_s13 }
  0x10   : > { %p395_p11 = pnand %p394_p10, %p41_p1  ;;  %p35_p0 = scmp.eq.s32.totalorder %s578_s15, 0 }
  0x11   : > { %s663_s29 = scalar_select %p25_p12, %s574_s14, %s27_s27  }
  0x12   : > { %397 = dma.hbm_to_vmem [thread:$0]  (!%p395_p11), %s132_s22, 128, %s134_s25, [#allocation6]  }
  0x13   : > { %p667_p3 = por %p106_p2, %p34_p13  ;;  %p407_p5 = scmp.lt.s32.totalorder %s578_s15, 2 }
  0x14   : > { %s147_s4 = sand.u32 1, %s574_s14   ;;  %s384_s5 = sshll.u32 %s578_s15, 4 }
  0x15   : > { %p36_p7 = por %p35_p0, %p34_p13  ;;  %s370_s6 = sshll.u32 %s147_s4, 4 }
  0x16   : > { %s156_s9 = scalar_lea.hbm %s746_s0, %s384_s5  ;;  %s151_s11 = scalar_lea.vmem [#allocation2], %s370_s6 }
  0x17   : > { %s158_s10 = sshll.u32 %s156_s9, 4  ;;  %s160_s17 = sshll.u32 %s151_s11, 4  ;;  %s159_s10 = int_to_ptr.hbm [resolvable:$true] %s158_s10  ;;  %s161_s17 = int_to_ptr.vmem [resolvable:$true] %s160_s17 }
  0x18   : > { %p677_p10 = pnand %p407_p5, %p36_p7  ;;  %s148_s21 = scalar_lea.sflag [#allocation3], %s147_s4 }
  0x19   : > { %s478_s22 = sshra.s32 %s159_s10, 4  ;;  %s485_s28 = scalar_lea.hbm %s746_s0, 32  ;;  %s479_s22 = int_to_ptr.hbm [resolvable:$true] %s478_s22 }
  0x1a   : > { %s480_s24 = scalar_lea.hbm %s479_s22, 16  ;;  %p482_p11 = pneg %p677_p10 }
  0x1b   : > { %p481_p2 = scmp.ne.s32.totalorder %s479_s22, %s480_s24  ;;  %p486_p0 = scmp.lt.s32.totalorder %s479_s22, %s746_s0 }
  0x1c   : > { %p487_p5 = scmp.lt.s32.totalorder %s485_s28, %s480_s24 }
  0x1d   : > { %p483_p12 = pnand %p482_p11, %p481_p2 }
  0x1e   : > { %p488_p7 = por %p487_p5, %p486_p0 }
  0x1f   : > { %p484_p13 = pneg %p483_p12 }
  0x21   : > { %p489_p9 = pnand %p488_p7, %p484_p13 }
  0x23   : > { %492 = shalt.err (!%p489_p9)
}
  0x24   : > { %401 = dma.hbm_to_vmem [thread:$0]  (!%p677_p10), %s159_s10, 256, %s161_s17, %s148_s21  }
  0x25   : > { %169 = sbr.rel (%p644_p8) target bundleno = 447 (0x1bf), region = 32  ;;  %s694_s4 = sand.u32 (!%p644_p8), 1, %s570_s13  }
  0x26   : > { %s374_s7 = sshll.u32 (!%p644_p8), %s694_s4, 4  ;;  %s172_s8 = scalar_lea.sflag (!%p644_p8), [#allocation3], %s694_s4 }
  0x27   : > { %s175_s9 = scalar_lea.vmem (!%p644_p8), [#allocation2], %s374_s7 }
  0x2a   : > { %553 = dma.done.wait (%p631_p4), %s172_s8, 256  }
  0x2b   : > { %555 = vsyncadd (%p631_p4), %s172_s8, 4294967040 }
  0x2c   : > { %557 = dma.done.wait (%p41_p1), [#allocation6], 128  }
  0x2d   : > { %559 = vsyncadd (%p41_p1), [#allocation6], 4294967168  ;;  %v204_v0 = vld [vmem:[%s175_s9] sm:$0xff]  ;;  %v205_v1 = vld [vmem:[%s175_s9 + $0x8] sm:$0xff]  ;;  %v213_v4 = vlaneseq  ;;  %vm216_vm0 = vcmask 64512   ;;  %s385_s10 = sshll.u32 %s622_s16, 4 }
  0x2e   : > { %v206_v2 = vadd.f32 %v205_v1, %v204_v0  ;;  %v210_v3 = vld [vmem:[#allocation5] sm:$0xff]  ;;  %s281_s20 = scalar_lea.hbm %s749_s3, %s385_s10  ;;  %s203_s21 = scalar_lea.vmem [#allocation7], %s374_s7 }
  0x2f   : > { %234 = vmatpush.msra.mxu0 %v210_v3  ;;  %v214_v5 = vand.u32 127, %v213_v4  ;;  %v260_v9 = vshrl.u32 %v213_v4, 7  ;;  %v211_v10 = vld [vmem:[%s748_s2] sm:$0x1]  ;;  %s283_s22 = sshll.u32 %s203_s21, 4  ;;  %s285_s24 = sshll.u32 %s281_s20, 4  ;;  %s284_s22 = int_to_ptr.vmem [resolvable:$true] %s283_s22  ;;  %s286_s24 = int_to_ptr.hbm [resolvable:$true] %s285_s24 }
  0x30   : > { %207 = vadd.xlane.f32.xlu0 %v206_v2  ;;  %s270_s25 = scalar_lea.sflag [#allocation4], %s694_s4  ;;  %s522_s27 = sshra.s32 %s286_s24, 4  ;;  %s523_s27 = int_to_ptr.hbm [resolvable:$true] %s522_s27 }
  0x31   : > { %443 = vset.pattern.permute.xlu0 %v260_v9  ;;  %s524_s16 = scalar_lea.hbm %s523_s27, 16  ;;  %s528_s6 = scalar_lea.hbm %s749_s3, 32 }
  0x32   : > { %p525_p1 = scmp.ne.s32.totalorder %s523_s27, %s524_s16  ;;  %p529_p9 = scmp.lt.s32.totalorder %s523_s27, %s749_s3 }
  0x33   : > { %p530_p10 = scmp.lt.s32.totalorder %s528_s6, %s524_s16 }
  0x34   : > { %p526_p4 = pnand %p525_p1, %p667_p3 }
  0x35   : > { %p531_p2 = por %p530_p10, %p529_p9 }
  0x36   : > { %p527_p8 = pneg %p526_p4 }
  0x38   : > { %p532_p11 = pnand %p531_p2, %p527_p8 }
  0xa3   : > { %v208_v6 = vpop.xlane.xlu0 %207 }
  0xa4   : > { %v209_v7 = vmul.f32 0.00390625, %v208_v6 }
  0xa6   : > { %v215_v8 = vperm.slane %v209_v7, %v214_v5 }
  0xa8   : > { %377 = vmatmul.msk.f32.vlgmr.msra.gmra.mxu0 %vm216_vm0, %v215_v8 }
 0x125   : > { %v236_v11 = vpop.f32.mrf.mxu0 }
 0x126   : > { %v237_v12 = vadd.f32 %v236_v11, %v211_v10 }
 0x128   : > { %v378_v13 = vmul.f32 -1.442695, %v237_v12 }
 0x12a   : > { %444 = vpow2.f32 %v378_v13 }
 0x130   : > { %v445_v14 = vpop.eup %444 }
 0x131   : > { %v242_v15 = vadd.f32 1.0, %v445_v14 }
 0x133   : > { %446 = vrcp.f32 %v242_v15  ;;  %v254_v19 = vand.u32 2147483648, %v242_v15  ;;  %v252_v21 = vand.u32 2147483647, %v242_v15  ;;  %vm248_vm2 = vweird.f32 %v242_v15 }
 0x135   : > { %v255_v23 = vor.u32 1.1754944e-38, %v254_v19  ;;  %vm253_vm4 = vcmp.eq.f32.partialorder %v252_v21, 8.507059e+37 }
 0x139   : > { %v447_v16 = vpop.eup %446 }
 0x13a   : > { %v244_v17 = vmul.f32 %v447_v16, %v242_v15  ;;  %vm249_vm1 = vweird.f32 %v447_v16 }
 0x13b   : > { %vm250_vm3 = vmor %vm248_vm2, %vm249_vm1 }
 0x13c   : > { %v245_v18 = vsub.f32 1.0, %v244_v17 }
 0x13e   : > { %v246_v20 = vmul.f32 %v447_v16, %v245_v18 }
 0x140   : > { %v247_v22 = vadd.f32 %v447_v16, %v246_v20 }
 0x142   : > { %v251_v24 = vsel %vm250_vm3, %v447_v16, %v247_v22 }
 0x143   : > { %v256_v25 = vsel %vm253_vm4, %v255_v23, %v251_v24 }
 0x144   : > { %v258_v26 = vperm.slane %v256_v25, 0 }
 0x146   : > { %263 = vperm.xlu0 %443, %v258_v26  }
 0x1b8   : > { %v264_v27 = vpop.permute.xlu0 %263 }
 0x1b9   : > { %v265_v28 = vmul.f32 %v264_v27, %v204_v0  ;;  %v266_v29 = vmul.f32 %v264_v27, %v205_v1 }
 0x1bb   : > { %267 = vst [vmem:[%s203_s21] sm:$0xff] %v265_v28 }
 0x1bc   : > { %268 = vst [vmem:[%s203_s21 + $0x8] sm:$0xff] %v266_v29 }
 0x1bd   : > { %535 = shalt.err (!%p532_p11)
}
 0x1be   : > { %392 = dma.vmem_to_hbm [thread:$0]  (%p667_p3), %s284_s22, 256, %s286_s24, %s270_s25  }
 0x1bf PF: > { %s297_s4 = sand.u32 1, %s566_s12   ;;  %p755_p12 = scmp.ge.s32.totalorder %s578_s15, 2 }
 0x1c0   : > { %s298_s9 = scalar_lea.sflag [#allocation4], %s297_s4 }
 0x1c1   : > { %p403_p13 = pnand %p755_p12, %p636_p6 }
 0x1c3   : > { %p404_p0 = pneg %p403_p13 }
 0x1c5   : > { %561 = dma.done.wait (%p404_p0), %s298_s9, 256  }
 0x1c6   : > { %563 = vsyncadd (%p404_p0), %s298_s9, 4294967040  ;;  %p17_p5 = scmp.ge.s32.totalorder %s654_s26, 4   ;;  %s756_s12 = smov %s570_s13 }
 0x1c7   : > { %s757_s13 = smov %s574_s14  ;;  %s758_s14 = smov %s663_s29 }
 0x1c8   : > { %s759_s15 = smov %s654_s26  ;;  %19 = sbr.rel (!%p17_p5) target bundleno = 6 (0x6), region = 81 }
 0x1cd   :  { %304 = vsyncpa [#allocation3], 1 }
 0x1ce   :  { %306 = vsyncpa [#allocation3 + $0x1], 1 }
 0x1cf   :  { %307 = vsyncpa [#allocation6], 1 }
 0x1d0   :  { %308 = vsyncpa [#allocation4], 1 }
 0x1d1   :  { %310 = vsyncpa [#allocation4 + $0x1], 1 }

</bundles_post_ra>
